<compile_context>
chip_gen: v7x
topology: tpu7x:2x2x1
jax: 0.10.0
libtpu: 0.0.40
codegen_flags: <defaults>
</compile_context>

<pallas_src>
import functools
import math

import jax
import jax.numpy as jnp
from jax.experimental import pallas as pl
from jax.experimental.pallas import tpu as pltpu

S_SCALE = 30.0
MARGIN = 0.4
EPS = 1e-7
COS_M = float(math.cos(MARGIN))
SIN_M = float(math.sin(MARGIN))


def _arcloss_kernel(x_ref, w_ref, labels_ref, cos_ref, loss_ref,
                    xn_sc, l_sc, tgt_sc,
                    *, num_classes, block_c, has_pad, matmul_precision):
    c = pl.program_id(1)

    # ---- once per B-tile: L2-normalize x (f32) and reset the accumulators.
    @pl.when(c == 0)
    def _init():
        x = x_ref[...].astype(jnp.float32)
        sumsq = jnp.sum(x * x, axis=1, keepdims=True)
        # F.normalize(x, p=2, dim=1): x / max(||x||, 1e-12)  (rsqrt, no divide)
        inv = jax.lax.rsqrt(jnp.maximum(sumsq, 1e-24))
        xn_sc[...] = (x * inv).astype(xn_sc.dtype)
        l_sc[...] = jnp.zeros_like(l_sc)      # sum_{j!=y} exp(s*cos_j - s)
        tgt_sc[...] = jnp.zeros_like(tgt_sc)  # cos_theta[i, labels[i]]

    # ---- cos_theta tile = normalize(x) @ W^T.  Weight arrives already in its
    #      DMA/matmul dtype (bf16 on the fast path) — no in-kernel cast.
    cos = jax.lax.dot_general(
        xn_sc[...], w_ref[...],
        dimension_numbers=(((1,), (1,)), ((), ())),
        preferred_element_type=jnp.float32,
        precision=matmul_precision,
    )
    cos_ref[...] = cos.astype(cos_ref.dtype)

    tb, tc = cos.shape
    col = c * block_c + jax.lax.broadcasted_iota(jnp.int32, (tb, tc), 1)
    lbl = labels_ref[...]                       # (TB, 1) int32
    is_target = col == lbl                      # labels < num_classes, so padded
                                                # columns can never be the target

    # Target logit (label lives in exactly one class tile per row).
    tgt_sc[...] += jnp.sum(jnp.where(is_target, cos, 0.0), axis=1, keepdims=True)

    # ---- accumulate sum_{j != y, j < C} exp(s*cos_j - s).  Static shift by
    # S_SCALE is overflow-safe: s*cos <= 30  =>  exp(...) <= 1.
    # TODO(synk): on v6e/v7x the EUP has a bf16 path; exp could take bf16 inputs
    # (f32 accumulation) for ~2x transcendental throughput.
    p = jnp.exp(S_SCALE * (cos - 1.0))
    keep = jnp.logical_not(is_target)
    if has_pad:                                 # Python-static: only emitted when
        keep = jnp.logical_and(keep, col < num_classes)  # the last C tile is padded
    l_sc[...] += jnp.sum(jnp.where(keep, p, 0.0), axis=1, keepdims=True)

    # ---- finalize on the last class tile.
    @pl.when(c == pl.num_programs(1) - 1)
    def _fin():
        t = jnp.clip(tgt_sc[...], -1.0 + EPS, 1.0 - EPS)
        # s * cos(acos(t) + m) == s * (t*cos(m) - sqrt(1 - t^2)*sin(m))  (<= s)
        num = S_SCALE * (t * COS_M - jnp.sqrt(1.0 - t * t) * SIN_M)
        # log( exp(num) + sum_{j!=y} exp(s*cos_j) ), shifted by the static S_SCALE
        log_denom = S_SCALE + jnp.log(jnp.exp(num - S_SCALE) + l_sc[...])
        loss_ref[...] = num - log_denom


def _vmem_capacity_bytes():
    try:
        cap = getattr(pltpu.get_tpu_info(), "vmem_capacity_bytes", None)
        if cap:
            return int(cap)
    except Exception:
        pass
    return 64 * 1024 * 1024   # unknown -> assume the small (v7x-like) budget


def _choose_tiles(batch, num_classes, feat_dim, w_bytes):
    """Pick (TB, TC, vmem_limit).  Weight HBM reads scale as B/TB, so TB is as
    large as the VMEM budget allows; TC is sized so the double-buffered weight
    tile and the double-buffered f32 cos tile fit their budgets."""
    vmem = _vmem_capacity_bytes()
    small_vmem = vmem <= 96 * 1024 * 1024          # v7x: 64 MiB per TensorCore

    tb_cap = 512 if small_vmem else 1024
    tb = batch if batch <= tb_cap else tb_cap
    # v7x megacore: make sure the "parallel" batch axis spans both TensorCores.
    if small_vmem and batch >= 16 and tb == batch:
        half = -(-batch // 2)
        tb = max(8, ((half + 7) // 8) * 8)
    # Keep the double-buffered x tile modest if the feature dim is huge.
    while tb > 256 and 2 * tb * max(feat_dim, 1) * 4 > 16 * 1024 * 1024:
        tb //= 2

    w_budget = (16 if small_vmem else 16) * 1024 * 1024     # 2 weight buffers
    cos_budget = (16 if small_vmem else 40) * 1024 * 1024   # 2 f32 cos buffers
    cap_w = w_budget // (2 * w_bytes * max(feat_dim, 1))
    cap_cos = cos_budget // (2 * 4 * max(tb, 1))
    cap = max(128, (min(cap_w, cap_cos) // 128) * 128)
    tc = num_classes if num_classes <= cap else cap

    vmem_limit = (40 if small_vmem else 96) * 1024 * 1024
    return tb, tc, vmem_limit


def arc_loss_forward(x, weight, labels, *, use_bf16_matmul=True,
                     block_b=None, block_c=None, cos_dtype=jnp.float32):
    """ArcLoss forward.
    x: (B, D) f32; weight: (C, D) f32 (nn.Linear weight, NOT transposed);
    labels: (B,) int. Returns (cos_theta (B, C) cos_dtype, scalar loss)."""
    batch, feat = x.shape
    num_classes = weight.shape[0]

    matmul_dtype = jnp.bfloat16 if use_bf16_matmul else jnp.float32
    w_bytes = 2 if use_bf16_matmul else 4
    # Exact path uses HIGHEST for the f32 tests; for production f32 consider
    # jax.lax.Precision.HIGH (3 MXU passes instead of ~6).
    matmul_precision = None if use_bf16_matmul else jax.lax.Precision.HIGHEST

    tb, tc, vmem_limit = _choose_tiles(batch, num_classes, feat, w_bytes)
    if block_b is not None:
        tb = block_b
    if block_c is not None:
        tc = block_c
    has_pad = (num_classes % tc) != 0

    grid = (pl.cdiv(batch, tb), pl.cdiv(num_classes, tc))
    labels2d = labels.astype(jnp.int32).reshape(batch, 1)
    # Cast the weight in the wrapper so the DMA itself moves bf16 (dominant
    # HBM stream, re-read once per B-tile).  x stays f32 (tiny, normalized
    # in f32 inside the kernel).
    w_in = weight.astype(matmul_dtype) if use_bf16_matmul else weight

    kernel = functools.partial(
        _arcloss_kernel,
        num_classes=num_classes, block_c=tc, has_pad=has_pad,
        matmul_precision=matmul_precision)

    cos_theta, per_row = pl.pallas_call(
        kernel,
        out_shape=(
            jax.ShapeDtypeStruct((batch, num_classes), cos_dtype),
            jax.ShapeDtypeStruct((batch, 1), jnp.float32),
        ),
        grid_spec=pltpu.PrefetchScalarGridSpec(
            num_scalar_prefetch=0,
            grid=grid,
            in_specs=[
                pl.BlockSpec((tb, feat), lambda b, c: (b, 0)),   # x (f32)
                pl.BlockSpec((tc, feat), lambda b, c: (c, 0)),   # weight (C, D)
                pl.BlockSpec((tb, 1), lambda b, c: (b, 0)),      # labels
            ],
            out_specs=(
                pl.BlockSpec((tb, tc), lambda b, c: (b, c)),     # cos_theta
                pl.BlockSpec((tb, 1), lambda b, c: (b, 0)),      # per-row loss
            ),
            scratch_shapes=[
                pltpu.VMEM((tb, feat), matmul_dtype),  # normalized x (per B-tile)
                pltpu.VMEM((tb, 1), jnp.float32),      # sum_{j!=y} exp(s*cos - s)
                pltpu.VMEM((tb, 1), jnp.float32),      # target cos accumulator
            ],
        ),
        compiler_params=pltpu.CompilerParams(
            dimension_semantics=("parallel", "arbitrary"),
            vmem_limit_bytes=vmem_limit,
        ),
    )(x, w_in, labels2d)

    loss = -jnp.mean(per_row)      # -loss.mean() from the reference
    return cos_theta, loss


def _reference(x, weight, labels):
    """Pure-JAX reference mirroring the PyTorch forward."""
    xn = x / jnp.maximum(jnp.linalg.norm(x, axis=1, keepdims=True), 1e-12)
    cos = jnp.dot(xn, weight.T, precision=jax.lax.Precision.HIGHEST)
    tgt = cos[jnp.arange(x.shape[0]), labels]
    t = jnp.clip(tgt, -1.0 + EPS, 1.0 - EPS)
    num = S_SCALE * jnp.cos(jnp.arccos(t) + MARGIN)
    onehot = jax.nn.one_hot(labels, cos.shape[1], dtype=cos.dtype)
    excl = jnp.sum(jnp.exp(S_SCALE * cos) * (1.0 - onehot), axis=1)
    denom = jnp.exp(num) + excl
    loss = num - jnp.log(denom)
    return cos, -jnp.mean(loss)


if __name__ == "__main__":
    key = jax.random.PRNGKey(0)
    kx, kw, kl, kx2, kw2, kl2 = jax.random.split(key, 6)

    # --- test 1: small shapes matching the module, exact (f32) matmul path.
    B, D, C = 8, 32, 16
    bound = 1.0 / math.sqrt(D)
    x = jax.random.normal(kx, (B, D), dtype=jnp.float32)
    weight = jax.random.uniform(kw, (C, D), minval=-bound, maxval=bound,
                                dtype=jnp.float32)
    labels = jax.random.randint(kl, (B,), 0, C, dtype=jnp.int32)

    cos, loss = arc_loss_forward(x, weight, labels, use_bf16_matmul=False)
    jax.block_until_ready((cos, loss))
    rcos, rloss = _reference(x, weight, labels)
    assert jnp.allclose(cos, rcos, atol=2e-5, rtol=2e-5), "cos mismatch (f32)"
    assert jnp.allclose(loss, rloss, atol=1e-4, rtol=1e-4), "loss mismatch (f32)"

    # --- test 2: multi-tile grid (2 x 2) with a padded class tile, f32 path.
    B2, D2, C2 = 16, 32, 200
    x2 = jax.random.normal(kx2, (B2, D2), dtype=jnp.float32)
    weight2 = jax.random.uniform(kw2, (C2, D2), minval=-bound, maxval=bound,
                                 dtype=jnp.float32)
    labels2 = jax.random.randint(kl2, (B2,), 0, C2, dtype=jnp.int32)
    cos2, loss2 = arc_loss_forward(x2, weight2, labels2, use_bf16_matmul=False,
                                   block_b=8, block_c=128)
    jax.block_until_ready((cos2, loss2))
    rcos2, rloss2 = _reference(x2, weight2, labels2)
    assert jnp.allclose(cos2, rcos2, atol=2e-5, rtol=2e-5), "cos mismatch (tiled)"
    assert jnp.allclose(loss2, rloss2, atol=1e-4, rtol=1e-4), "loss mismatch (tiled)"

    # --- test 3: default perf path (bf16 weight DMA + matmul, f32 accumulation).
    cos3, loss3 = arc_loss_forward(x, weight, labels)
    jax.block_until_ready((cos3, loss3))
    assert jnp.allclose(cos3, rcos, atol=5e-2), "cos mismatch (bf16)"
    assert bool(jnp.isfinite(loss3)), "non-finite loss (bf16)"
    assert abs(float(loss3) - float(rloss)) < 2.0, "loss mismatch (bf16)"

    print("KERNEL_OK")
</pallas_src>

<mosaic_0001>
module attributes {stable_mosaic.version = 11 : i64} {
  func.func @_arcloss_kernel(%arg0: i32, %arg1: i32, %arg2: memref<8x32xf32, #tpu.memory_space<vmem>>, %arg3: memref<16x32xf32, #tpu.memory_space<vmem>>, %arg4: memref<8x1xi32, #tpu.memory_space<vmem>>, %arg5: memref<8x16xf32, #tpu.memory_space<vmem>>, %arg6: memref<8x1xf32, #tpu.memory_space<vmem>>, %arg7: memref<8x32xf32, #tpu.memory_space<vmem>>, %arg8: memref<8x1xf32, #tpu.memory_space<vmem>>, %arg9: memref<8x1xf32, #tpu.memory_space<vmem>>) attributes {dimension_semantics = [#tpu.dimension_semantics<parallel>, #tpu.dimension_semantics<arbitrary>], iteration_bounds = array<i64: 1, 1>, scalar_prefetch = 0 : i64, scratch_operands = 3 : i64, tpu.core_type = #tpu.core_type<tc>, window_params = [{transform_indices = @transform_0, window_bounds = array<i64: 8, 32>}, {transform_indices = @transform_1, window_bounds = array<i64: 16, 32>}, {transform_indices = @transform_2, window_bounds = array<i64: 8, 1>}, {transform_indices = @transform_3, window_bounds = array<i64: 8, 16>}, {transform_indices = @transform_4, window_bounds = array<i64: 8, 1>}]} {
    %c0_i32 = arith.constant 0 : i32
    %0 = arith.cmpi eq, %arg1, %c0_i32 : i32
    %1 = arith.extui %0 : i1 to i32
    %c0_i32_0 = arith.constant 0 : i32
    %2 = arith.cmpi ne, %1, %c0_i32_0 : i32
    scf.if %2 {
      %c0_25 = arith.constant 0 : index
      %c0_26 = arith.constant 0 : index
      %37 = vector.load %arg2[%c0_25, %c0_26] : memref<8x32xf32, #tpu.memory_space<vmem>>, vector<8x32xf32>
      %38 = arith.mulf %37, %37 : vector<8x32xf32>
      %cst_27 = arith.constant dense<0.000000e+00> : vector<8xf32>
      %39 = vector.multi_reduction <add>, %38, %cst_27 [1] : vector<8x32xf32> to vector<8xf32>
      %40 = vector.shape_cast %39 : vector<8xf32> to vector<8x1xf32>
      %cst_28 = arith.constant 1.000000e-24 : f32
      %41 = vector.broadcast %cst_28 : f32 to vector<8x1xf32>
      %42 = arith.maximumf %40, %41 : vector<8x1xf32>
      %43 = math.rsqrt %42 : vector<8x1xf32>
      %44 = vector.broadcast %43 : vector<8x1xf32> to vector<8x32xf32>
      %45 = arith.mulf %37, %44 : vector<8x32xf32>
      %c0_29 = arith.constant 0 : index
      %c0_30 = arith.constant 0 : index
      %46 = vector.load %arg7[%c0_29, %c0_30] : memref<8x32xf32, #tpu.memory_space<vmem>>, vector<8x32xf32>
      tpu.vector_store %arg7[%c0_29, %c0_30], %45 {strides = array<i32>} : memref<8x32xf32, #tpu.memory_space<vmem>>, vector<8x32xf32>,
      %cst_31 = arith.constant 0.000000e+00 : f32
      %47 = vector.broadcast %cst_31 : f32 to vector<8x1xf32>
      %c0_32 = arith.constant 0 : index
      %c0_33 = arith.constant 0 : index
      %48 = vector.load %arg8[%c0_32, %c0_33] : memref<8x1xf32, #tpu.memory_space<vmem>>, vector<8x1xf32>
      tpu.vector_store %arg8[%c0_32, %c0_33], %47 {strides = array<i32>} : memref<8x1xf32, #tpu.memory_space<vmem>>, vector<8x1xf32>,
      %cst_34 = arith.constant 0.000000e+00 : f32
      %49 = vector.broadcast %cst_34 : f32 to vector<8x1xf32>
      %c0_35 = arith.constant 0 : index
      %c0_36 = arith.constant 0 : index
      %50 = vector.load %arg9[%c0_35, %c0_36] : memref<8x1xf32, #tpu.memory_space<vmem>>, vector<8x1xf32>
      tpu.vector_store %arg9[%c0_35, %c0_36], %49 {strides = array<i32>} : memref<8x1xf32, #tpu.memory_space<vmem>>, vector<8x1xf32>,
    } else {
    }
    %c0 = arith.constant 0 : index
    %c0_1 = arith.constant 0 : index
    %3 = vector.load %arg7[%c0, %c0_1] : memref<8x32xf32, #tpu.memory_space<vmem>>, vector<8x32xf32>
    %c0_2 = arith.constant 0 : index
    %c0_3 = arith.constant 0 : index
    %4 = vector.load %arg3[%c0_2, %c0_3] : memref<16x32xf32, #tpu.memory_space<vmem>>, vector<16x32xf32>
    %cst = arith.constant dense<0.000000e+00> : vector<8x16xf32>
    %5 = tpu.matmul %3, %4, %cst {dimension_numbers = #tpu.dot_dimension_numbers<[1], [1], [0], [0], [0, 0, 1, 0], [], []>, precision = #tpu.contract_precision<fp32>} : vector<8x32xf32>, vector<16x32xf32>, vector<8x16xf32> -> vector<8x16xf32>
    %c0_4 = arith.constant 0 : index
    %c0_5 = arith.constant 0 : index
    %6 = vector.load %arg5[%c0_4, %c0_5] : memref<8x16xf32, #tpu.memory_space<vmem>>, vector<8x16xf32>
    tpu.vector_store %arg5[%c0_4, %c0_5], %5 {strides = array<i32>} : memref<8x16xf32, #tpu.memory_space<vmem>>, vector<8x16xf32>,
    %c16_i32 = arith.constant 16 : i32
    %7 = arith.muli %arg1, %c16_i32 : i32
    %8 = tpu.iota {dimensions = array<i32: 1>} : vector<8x16xi32>
    %9 = vector.broadcast %7 : i32 to vector<8x16xi32>
    %10 = arith.addi %9, %8 : vector<8x16xi32>
    %c0_6 = arith.constant 0 : index
    %c0_7 = arith.constant 0 : index
    %11 = vector.load %arg4[%c0_6, %c0_7] : memref<8x1xi32, #tpu.memory_space<vmem>>, vector<8x1xi32>
    %12 = vector.broadcast %11 : vector<8x1xi32> to vector<8x16xi32>
    %13 = arith.cmpi eq, %10, %12 : vector<8x16xi32>
    %c0_8 = arith.constant 0 : index
    %c0_9 = arith.constant 0 : index
    %14 = vector.load %arg9[%c0_8, %c0_9] : memref<8x1xf32, #tpu.memory_space<vmem>>, vector<8x1xf32>
    %cst_10 = arith.constant 0.000000e+00 : f32
    %15 = vector.broadcast %cst_10 : f32 to vector<8x16xf32>
    %16 = arith.select %13, %5, %15 : vector<8x16xi1>, vector<8x16xf32>
    %cst_11 = arith.constant dense<0.000000e+00> : vector<8xf32>
    %17 = vector.multi_reduction <add>, %16, %cst_11 [1] : vector<8x16xf32> to vector<8xf32>
    %18 = vector.shape_cast %17 : vector<8xf32> to vector<8x1xf32>
    %19 = arith.addf %14, %18 : vector<8x1xf32>
    %c0_12 = arith.constant 0 : index
    %c0_13 = arith.constant 0 : index
    %20 = vector.load %arg9[%c0_12, %c0_13] : memref<8x1xf32, #tpu.memory_space<vmem>>, vector<8x1xf32>
    tpu.vector_store %arg9[%c0_12, %c0_13], %19 {strides = array<i32>} : memref<8x1xf32, #tpu.memory_space<vmem>>, vector<8x1xf32>,
    %cst_14 = arith.constant 1.000000e+00 : f32
    %21 = vector.broadcast %cst_14 : f32 to vector<8x16xf32>
    %22 = arith.subf %5, %21 : vector<8x16xf32>
    %cst_15 = arith.constant 3.000000e+01 : f32
    %23 = vector.broadcast %cst_15 : f32 to vector<8x16xf32>
    %24 = arith.mulf %23, %22 : vector<8x16xf32>
    %25 = math.exp %24 : vector<8x16xf32>
    %cst_16 = arith.constant dense<true> : vector<8x16xi1>
    %26 = arith.xori %13, %cst_16 : vector<8x16xi1>
    %c0_17 = arith.constant 0 : index
    %c0_18 = arith.constant 0 : index
    %27 = vector.load %arg8[%c0_17, %c0_18] : memref<8x1xf32, #tpu.memory_space<vmem>>, vector<8x1xf32>
    %cst_19 = arith.constant 0.000000e+00 : f32
    %28 = vector.broadcast %cst_19 : f32 to vector<8x16xf32>
    %29 = arith.select %26, %25, %28 : vector<8x16xi1>, vector<8x16xf32>
    %cst_20 = arith.constant dense<0.000000e+00> : vector<8xf32>
    %30 = vector.multi_reduction <add>, %29, %cst_20 [1] : vector<8x16xf32> to vector<8xf32>
    %31 = vector.shape_cast %30 : vector<8xf32> to vector<8x1xf32>
    %32 = arith.addf %27, %31 : vector<8x1xf32>
    %c0_21 = arith.constant 0 : index
    %c0_22 = arith.constant 0 : index
    %33 = vector.load %arg8[%c0_21, %c0_22] : memref<8x1xf32, #tpu.memory_space<vmem>>, vector<8x1xf32>
    tpu.vector_store %arg8[%c0_21, %c0_22], %32 {strides = array<i32>} : memref<8x1xf32, #tpu.memory_space<vmem>>, vector<8x1xf32>,
    %c0_i32_23 = arith.constant 0 : i32
    %34 = arith.cmpi eq, %arg1, %c0_i32_23 : i32
    %35 = arith.extui %34 : i1 to i32
    %c0_i32_24 = arith.constant 0 : i32
    %36 = arith.cmpi ne, %35, %c0_i32_24 : i32
    scf.if %36 {
      %c0_25 = arith.constant 0 : index
      %c0_26 = arith.constant 0 : index
      %37 = vector.load %arg9[%c0_25, %c0_26] : memref<8x1xf32, #tpu.memory_space<vmem>>, vector<8x1xf32>
      %cst_27 = arith.constant -0.99999988 : f32
      %cst_28 = arith.constant 0.99999988 : f32
      %38 = vector.broadcast %cst_27 : f32 to vector<8x1xf32>
      %39 = arith.maximumf %38, %37 : vector<8x1xf32>
      %40 = vector.broadcast %cst_28 : f32 to vector<8x1xf32>
      %41 = arith.minimumf %40, %39 : vector<8x1xf32>
      %cst_29 = arith.constant 0.921060979 : f32
      %42 = vector.broadcast %cst_29 : f32 to vector<8x1xf32>
      %43 = arith.mulf %41, %42 : vector<8x1xf32>
      %44 = arith.mulf %41, %41 : vector<8x1xf32>
      %cst_30 = arith.constant 1.000000e+00 : f32
      %45 = vector.broadcast %cst_30 : f32 to vector<8x1xf32>
      %46 = arith.subf %45, %44 : vector<8x1xf32>
      %47 = math.sqrt %46 : vector<8x1xf32>
      %cst_31 = arith.constant 0.389418334 : f32
      %48 = vector.broadcast %cst_31 : f32 to vector<8x1xf32>
      %49 = arith.mulf %47, %48 : vector<8x1xf32>
      %50 = arith.subf %43, %49 : vector<8x1xf32>
      %cst_32 = arith.constant 3.000000e+01 : f32
      %51 = vector.broadcast %cst_32 : f32 to vector<8x1xf32>
      %52 = arith.mulf %51, %50 : vector<8x1xf32>
      %cst_33 = arith.constant 3.000000e+01 : f32
      %53 = vector.broadcast %cst_33 : f32 to vector<8x1xf32>
      %54 = arith.subf %52, %53 : vector<8x1xf32>
      %55 = math.exp %54 : vector<8x1xf32>
      %c0_34 = arith.constant 0 : index
      %c0_35 = arith.constant 0 : index
      %56 = vector.load %arg8[%c0_34, %c0_35] : memref<8x1xf32, #tpu.memory_space<vmem>>, vector<8x1xf32>
      %57 = arith.addf %55, %56 : vector<8x1xf32>
      %58 = math.log %57 : vector<8x1xf32>
      %cst_36 = arith.constant 3.000000e+01 : f32
      %59 = vector.broadcast %cst_36 : f32 to vector<8x1xf32>
      %60 = arith.addf %59, %58 : vector<8x1xf32>
      %61 = arith.subf %52, %60 : vector<8x1xf32>
      %c0_37 = arith.constant 0 : index
      %c0_38 = arith.constant 0 : index
      %62 = vector.load %arg6[%c0_37, %c0_38] : memref<8x1xf32, #tpu.memory_space<vmem>>, vector<8x1xf32>
      tpu.vector_store %arg6[%c0_37, %c0_38], %61 {strides = array<i32>} : memref<8x1xf32, #tpu.memory_space<vmem>>, vector<8x1xf32>,
    } else {
    }
    return
  }
  func.func @transform_0(%arg0: i32, %arg1: i32) -> (i32, i32) {
    %c0_i32 = arith.constant 0 : i32
    %c0_i32_0 = arith.constant 0 : i32
    return %arg0, %c0_i32 : i32, i32
  }
  func.func @transform_1(%arg0: i32, %arg1: i32) -> (i32, i32) {
    %c0_i32 = arith.constant 0 : i32
    %c0_i32_0 = arith.constant 0 : i32
    return %arg1, %c0_i32 : i32, i32
  }
  func.func @transform_2(%arg0: i32, %arg1: i32) -> (i32, i32) {
    %c0_i32 = arith.constant 0 : i32
    %c0_i32_0 = arith.constant 0 : i32
    return %arg0, %c0_i32 : i32, i32
  }
  func.func @transform_3(%arg0: i32, %arg1: i32) -> (i32, i32) {
    %c0_i32 = arith.constant 0 : i32
    return %arg0, %arg1 : i32, i32
  }
  func.func @transform_4(%arg0: i32, %arg1: i32) -> (i32, i32) {
    %c0_i32 = arith.constant 0 : i32
    %c0_i32_0 = arith.constant 0 : i32
    return %arg0, %c0_i32 : i32, i32
  }
}

</mosaic_0001>

<bundles_post_ra>
// kernel: tpu_custom_call.1
= control target key start
LH: loop header
LB: loop body
LE: loop exit
PB: predicated region body
PF: predicated region fallthrough
CT: control target
= control target key end

     0   :  { %10 = vsyncpa [#allocation6], 0  ;;  %s841_s0 = inlined_call_operand.vmem [shape: f32[8,32], index: 0, kind: input, shape index: {}]   ;;  %s842_s1 = inlined_call_operand.hbm [shape: f32[16,32], index: 1, kind: input, shape index: {}]   ;;  %s843_s2 = inlined_call_operand.vmem [shape: s32[8,1], index: 2, kind: input, shape index: {}]   ;;  %s844_s3 = inlined_call_operand.hbm [shape: f32[8,16], index: 3, kind: output, shape index: {0}]   ;;  %s845_s4 = inlined_call_operand.vmem [shape: f32[8,1], index: 4, kind: output, shape index: {1}]  }
   0x1   :  { %11 = vsyncpa [#allocation7], 0  ;;  %s758_s15 = smov [#allocation5]   ;;  %s710_s19 = scalar_lea.hbm %s842_s1, 256 }
   0x2   :  { %s19_s16 = sshll.u32 %s758_s15, 4  ;;  %p711_p0 = scmp.ne.s32.totalorder %s842_s1, %s710_s19  ;;  %s20_s16 = int_to_ptr.vmem [resolvable:$true] %s19_s16 }
   0x3   :  { %p714_p1 = scmp.lt.u32.totalorder %s710_s19, %s842_s1 }
   0x5   :  { %p716_p2 = pnand %p714_p1, %p711_p0 }
   0x7   :  { %719 = shalt.err (!%p716_p2)
}
   0x8   :  { %s720_s24 = scalar_lea.vmem %s20_s16, 256  ;;  %p725_p4 = scmp.lt.s32.totalorder %s20_s16, %s20_s16 }
   0x9   :  { %p721_p3 = scmp.ne.s32.totalorder %s20_s16, %s720_s24  ;;  %p726_p5 = scmp.lt.s32.totalorder %s720_s24, %s720_s24 }
   0xb   :  { %p727_p6 = por %p726_p5, %p725_p4 }
   0xd   :  { %p728_p7 = pnand %p727_p6, %p721_p3 }
   0xf   :  { %731 = shalt.err (!%p728_p7)
}
  0x10   :  { %s759_s25 = smov 128   ;;  %s760_s26 = smov 8  }
  0x11   :  { %25 = dma.hbm_to_vmem [thread:$0]  %s842_s1, 256, %s20_s16, [#allocation6], %s759_s25, %s759_s25, %s760_s26  }
  0x12   :  { %754 = dma.done.wait [#allocation6], 256  }
  0x13   :  { %755 = vsyncadd [#allocation6], 4294967040  ;;  %v35_v0 = vld [vmem:[%s841_s0] sm:$0xff]  ;;  %vm37_vm0 = vcmask 261120   ;;  %v49_v3 = vld [vmem:[#allocation5] sm:$0xff]  ;;  %v761_v5 = vmov 0.0|0.0   ;;  %v523_v36 = vlaneseq }
  0x14   :  { %v36_v1 = vmul.f32 %v35_v0, %v35_v0  ;;  %v50_v4 = vld [vmem:[#allocation5 + $0x8] sm:$0xff]  ;;  %672 = vmatprep.subr.bf16.mxu0 %v761_v5  ;;  %v56_v6 = vsel %vm37_vm0, %v49_v3, 0  ;;  %663 = vmatprep.subr.bf16.mxu1 %v761_v5  ;;  %vm762_vm1 = vmmov 0   ;;  %v763_v10 = vmov 0.0  }
  0x15   :  { %v59_v7 = vsel %vm37_vm0, %v50_v4, 0  ;;  %v62_v8 = vand.u32 4294901760, %v56_v6  ;;  %646 = vmatprep.mubr.msk.f32.mxu0 %vm762_vm1, %v763_v10  ;;  %625 = vmatprep.mubr.msk.f32.mxu1 %vm762_vm1, %v763_v10  ;;  %v527_v23 = vld [vmem:[%s843_s2] sm:$0xff]  ;;  %v764_v24 = vmov 0   ;;  %vm45_vm2 = vcmask 7168   ;;  %s766_s2 = smov [#allocation8]  }
  0x16   :  { %v38_v2 = vsel %vm37_vm0, %v36_v1, 0.0  ;;  %v65_v9 = vand.u32 4294901760, %v59_v7  ;;  %699 = vset.pattern.permute.xlu0 %v764_v24  ;;  %47 = vst.msk [vmem:[#allocation4] sm:$0xff] %vm45_vm2, %v763_v10  ;;  %46 = vst.msk [vmem:[#allocation3] sm:$0xff] %vm45_vm2, %v763_v10  ;;  %v524_v38 = vand.u32 127, %v523_v36  ;;  %vm520_vm4 = vcmask 130048  }
  0x17   :  { %39 = vadd.xlane.f32.xlu0 %v38_v2  ;;  %v140_v12 = vsub.f32 %v56_v6, %v62_v8  ;;  %vm765_vm5 = vmmov 1   ;;  %s587_s5 = sshll.u32 %s766_s2, 4  ;;  %s588_s5 = int_to_ptr.vmem [resolvable:$true] %s587_s5 }
  0x18   :  { %v664_v11 = vpack.c.bf16 %v65_v9, %v62_v8  ;;  %v147_v13 = vsub.f32 %v59_v7, %v65_v9  ;;  %s732_s6 = scalar_lea.vmem %s588_s5, 128  ;;  %p737_p9 = scmp.lt.s32.totalorder %s588_s5, %s588_s5 }
  0x19   :  { %v141_v14 = vand.u32 4294901760, %v140_v12  ;;  %p733_p8 = scmp.ne.s32.totalorder %s588_s5, %s732_s6  ;;  %p738_p10 = scmp.lt.s32.totalorder %s732_s6, %s732_s6 }
  0x1a   :  { %674 = vmatpush3.bf16.xpose.msra.mxu0 %v664_v11  ;;  %665 = vmatpush3.bf16.xpose.msra.mxu1 %v664_v11  ;;  %v148_v15 = vand.u32 4294901760, %v147_v13  ;;  %v670_v22 = vpack.c.bf16 %v147_v13, %v140_v12 }
  0x1b   :  { %675 = vmatprep.subr.bf16.mxu0 %v761_v5  ;;  %666 = vmatprep.subr.bf16.mxu1 %v761_v5  ;;  %v142_v17 = vsub.f32 %v140_v12, %v141_v14  ;;  %p739_p11 = por %p738_p10, %p737_p9 }
  0x1c   :  { %v676_v16 = vpack.c.bf16 %v148_v15, %v141_v14  ;;  %v149_v18 = vsub.f32 %v147_v13, %v148_v15 }
  0x1d   :  { %v143_v19 = vand.u32 4294901760, %v142_v17  ;;  %p740_p12 = pnand %p739_p11, %p733_p8 }
  0x1e   :  { %v150_v20 = vand.u32 4294901760, %v149_v18 }
  0x20   :  { %v667_v21 = vpack.c.bf16 %v150_v20, %v143_v19 }
  0x2d   :  { %529 = vperm.xlu0 %699, %v527_v23  }
  0xa4   :  { %v40_v25 = vpop.xlane.xlu0 %39 }
  0xa5   :  { %v41_v26 = vmax.f32 %v40_v25, 1e-24 }
  0xa7   :  { %700 = vrsqrt.f32 %v41_v26 }
  0xac   :  { %v530_v40 = vpop.permute.xlu0 %529 }
  0xad   :  { %vm531_vm3 = vcmp.eq.s32.totalorder %v524_v38, %v530_v40 }
  0xae   :  { %vm544_vm6 = vmxor %vm531_vm3, %vm765_vm5 }
  0xb1   :  { %v701_v27 = vpop.eup %700 }
  0xb2   :  { %v43_v28 = vmul.f32 %v701_v27, %v35_v0 }
  0xb4   :  { %44 = vst.msk [vmem:[#allocation2] sm:$0xff] %vm37_vm0, %v43_v28 }
  0xbb   :  { %v48_v29 = vld [vmem:[#allocation2] sm:$0xff] }
  0xbc   :  { %v53_v30 = vsel %vm37_vm0, %v48_v29, 0 }
  0xbd   :  { %v128_v31 = vand.u32 4294901760, %v53_v30 }
  0xbf   :  { %v129_v32 = vsub.f32 %v53_v30, %v128_v31 }
  0xc1   :  { %v130_v33 = vand.u32 4294901760, %v129_v32 }
  0xc3   :  { %647 = vmatmul.mubr.f32.vlgmr.msra.gmra.mrb[0].mxu0 %v130_v33  ;;  %v131_v34 = vsub.f32 %v129_v32, %v130_v33 }
  0xc4   :  { %677 = vmatpush3.bf16.xpose.msra.mxu0 %v676_v16  ;;  %653 = vmatprep.mubr.msk.f32.mxu0 %vm762_vm1, %v763_v10 }
  0xc5   :  { %v132_v35 = vand.u32 4294901760, %v131_v34  ;;  %678 = vmatprep.subr.bf16.mxu0 %v761_v5 }
  0xc7   :  { %626 = vmatmul.mubr.f32.vlgmr.msra.gmra.mrb[0].mxu1 %v132_v35 }
  0xc8   :  { %668 = vmatpush3.bf16.xpose.msra.mxu1 %v667_v21  ;;  %632 = vmatprep.mubr.msk.f32.mxu1 %vm762_vm1, %v763_v10 }
  0xc9   :  { %669 = vmatprep.subr.bf16.mxu1 %v761_v5 }
  0xcb   :  { %654 = vmatmul.mubr.f32.vlgmr.msra.gmra.mrb[0].mxu0 %v128_v31 }
  0xcc   :  { %680 = vmatpush3.bf16.xpose.msra.mxu0 %v664_v11  ;;  %660 = vmatprep.mubr.msk.f32.mxu0 %vm762_vm1, %v763_v10 }
  0xcf   :  { %633 = vmatmul.mubr.f32.vlgmr.msra.gmra.mrb[0].mxu1 %v128_v31 }
  0xd0   :  { %671 = vmatpush3.bf16.xpose.msra.mxu1 %v670_v22  ;;  %639 = vmatprep.mubr.msk.f32.mxu1 %vm762_vm1, %v763_v10 }
  0xd3   :  { %661 = vmatmul.mubr.f32.vlgmr.msra.gmra.mrb[0].mxu0 %v128_v31 }
  0xd7   :  { %640 = vmatmul.mubr.f32.vlgmr.msra.gmra.mrb[0].mxu1 %v129_v32 }
 0x1a6   :  { %v516_v37 = vpop.f32.mrb[0].mxu0 }
 0x1a7   :  { %v662_v39 = vpop.f32.mrb[1].mxu0 }
 0x1aa   :  { %v291_v41 = vpop.f32.mrb[0].mxu1 }
 0x1ab   :  { %v681_v42 = vadd.f32 %v516_v37, %v291_v41  ;;  %v641_v43 = vpop.f32.mrb[1].mxu1 }
 0x1ad   :  { %v600_v44 = vadd.f32 -1.0, %v681_v42  ;;  %v533_v45 = vsel %vm531_vm3, %v681_v42, 0.0  ;;  %521 = vst.msk [vmem:[#allocation8] sm:$0xff] %vm520_vm4, %v681_v42 }
 0x1ae   :  { %v534_v46 = vsel %vm520_vm4, %v533_v45, 0.0 }
 0x1af   :  { %v541_v47 = vmul.f32 30.0, %v600_v44  ;;  %535 = vadd.xlane.f32.xlu1 %v534_v46 }
 0x1b1   :  { %v542_v48 = vmul.f32 1.442695, %v541_v47 }
 0x1b3   :  { %702 = vpow2.f32 %v542_v48 }
 0x1bd   :  { %v703_v49 = vpop.eup %702 }
 0x1be   :  { %v546_v50 = vsel %vm544_vm6, %v703_v49, 0.0 }
 0x1bf   :  { %v547_v51 = vsel %vm520_vm4, %v546_v50, 0.0 }
 0x1c0   :  { %548 = vadd.xlane.f32.xlu1 %v547_v51 }
 0x1c1   :  { %743 = shalt.err (!%p740_p12)
}
 0x1c2   :  { %s744_s9 = scalar_lea.hbm %s844_s3, 128 }
 0x1c3   :  { %p745_p13 = scmp.ne.s32.totalorder %s844_s3, %s744_s9  ;;  %p748_p0 = scmp.lt.u32.totalorder %s744_s9, %s844_s3 }
 0x1c5   :  { %p750_p1 = pnand %p748_p0, %p745_p13 }
 0x1c7   :  { %753 = shalt.err (!%p750_p1)
}
 0x1c8   :  { %590 = dma.vmem_to_hbm [thread:$0]  %s588_s5, 128, %s844_s3, [#allocation7]   ;;  %v532_v52 = vld [vmem:[#allocation4] sm:$0xff]  ;;  %v545_v59 = vld [vmem:[#allocation3] sm:$0xff] }
 0x23c   :  { %v536_v53 = vpop.xlane.xlu1 %535 }
 0x23d   :  { %v537_v54 = vadd.f32 %v536_v53, %v532_v52 }
 0x23f   :  { %539 = vst.msk [vmem:[#allocation4] sm:$0xff] %vm45_vm2, %v537_v54 }
 0x246   :  { %v555_v55 = vld [vmem:[#allocation4] sm:$0xff] }
 0x247   :  { %v601_v56 = vclamps-f32 %v555_v55, 0.9999999 }
 0x249   :  { %v559_v57 = vmul.f32 %v601_v56, %v601_v56  ;;  %v558_v3 = vmul.f32 0.921061, %v601_v56 }
 0x24b   :  { %v560_v58 = vsub.f32 1.0, %v559_v57 }
 0x24d   :  { %704 = vrsqrt.f32 %v560_v58  ;;  %v549_v60 = vpop.xlane.xlu1 %548  ;;  %vm563_vm7 = vcmp.eq.f32.partialorder %v560_v58, inf  ;;  %v566_v0 = vand.u32 2147483648, %v560_v58  ;;  %vm565_vm8 = vcmp.eq.f32.partialorder %v560_v58, 0.0 }
 0x24e   :  { %v550_v61 = vadd.f32 %v549_v60, %v545_v59 }
 0x250   :  { %551 = vst.msk [vmem:[#allocation3] sm:$0xff] %vm45_vm2, %v550_v61 }
 0x257   :  { %v705_v62 = vpop.eup %704  ;;  %v574_v10 = vld [vmem:[#allocation3] sm:$0xff] }
 0x258   :  { %v562_v63 = vmul.f32 %v705_v62, %v560_v58 }
 0x25a   :  { %v564_v1 = vsel %vm563_vm7, %v560_v58, %v562_v63 }
 0x25b   :  { %v567_v2 = vsel %vm565_vm8, %v566_v0, %v564_v1 }
 0x25c   :  { %v568_v4 = vmul.f32 0.38941833, %v567_v2 }
 0x25e   :  { %v569_v5 = vsub.f32 %v558_v3, %v568_v4 }
 0x260   :  { %v570_v6 = vmul.f32 30.0, %v569_v5 }
 0x262   :  { %v602_v7 = vadd.f32 -30.0, %v570_v6 }
 0x264   :  { %v572_v8 = vmul.f32 1.442695, %v602_v7 }
 0x266   :  { %706 = vpow2.f32 %v572_v8 }
 0x270   :  { %v707_v9 = vpop.eup %706 }
 0x271   :  { %v575_v11 = vadd.f32 %v707_v9, %v574_v10 }
 0x273   :  { %708 = vlog2.f32 %v575_v11 }
 0x27d   :  { %v709_v12 = vpop.eup %708 }
 0x27e   :  { %v577_v13 = vmul.f32 0.6931472, %v709_v12 }
 0x280   :  { %v578_v14 = vadd.f32 30.0, %v577_v13 }
 0x282   :  { %v579_v15 = vsub.f32 %v570_v6, %v578_v14 }
 0x284   :  { %580 = vst.msk [vmem:[%s845_s4] sm:$0xff] %vm45_vm2, %v579_v15 }
 0x285   :  { %756 = dma.done.wait [#allocation7], 128  }
 0x286   :  { %757 = vsyncadd [#allocation7], 4294967168 }
 0x287   :  { %598 = vsyncpa [#allocation6], 1 }
 0x288   :  { %599 = vsyncpa [#allocation7], 1 }

</bundles_post_ra>
